<compile_context>
chip_gen: v5e
topology: v5e:2x2
jax: 0.10.0
libtpu: 0.0.40
codegen_flags: <defaults>
</compile_context>

<pallas_src>
import functools
from typing import NamedTuple

import jax
import jax.numpy as jnp
from jax.experimental import pallas as pl
from jax.experimental.pallas import tpu as pltpu


# ----------------------------------------------------------------------------
# Kernel
# ----------------------------------------------------------------------------
def _ffn_kernel(x_ref, w1_ref, b1_ref, w2_ref, b2_ref, o_ref, acc_ref):
    # x_ref:   (tm, d_model_p)
    # w1_ref:  (1, d_model_p, tf)   slab-major -> contiguous slab DMA
    # b1_ref:  (1, tf)
    # w2_ref:  (tf, d_model_p)
    # b2_ref:  (1, d_model_p)
    # o_ref:   (tm, d_model_p)
    # acc_ref: (tm, d_model_p) f32 scratch, resident across the k (d_ff) axis
    k = pl.program_id(1)

    @pl.when(k == 0)
    def _():
        # Seed the accumulator with b2 -> no epilogue add needed.
        acc_ref[...] = jnp.broadcast_to(
            b2_ref[...].astype(jnp.float32), acc_ref.shape)

    # Slab of the hidden layer: relu(x @ W1[:, k-slab] + b1[k-slab])
    h = jnp.dot(x_ref[...], w1_ref[0], preferred_element_type=jnp.float32)
    h = jnp.maximum(h + b1_ref[...].astype(jnp.float32), 0.0)
    # ReLU is per-column, so summing slab contributions into acc is exact.
    acc_ref[...] += jnp.dot(h.astype(w2_ref.dtype), w2_ref[...],
                            preferred_element_type=jnp.float32)

    @pl.when(k == pl.num_programs(1) - 1)
    def _():
        o_ref[...] = acc_ref[...].astype(o_ref.dtype)


# ----------------------------------------------------------------------------
# Config / parameter preparation (run ONCE, outside the hot path)
# ----------------------------------------------------------------------------
class FFNConfig(NamedTuple):
    gen: str
    tm: int          # max rows per tile (auto-shrunk per call for small M)
    tf: int          # d_ff slab width
    vmem_cap: int    # scoped-VMEM ceiling for this generation
    d_model_p: int   # padded d_model (lane multiple)
    d_ff_p: int      # padded d_ff (multiple of tf)


def _round_up(x, m):
    return (x + m - 1) // m * m


def _cdiv(a, b):
    return (a + b - 1) // b


def _tpu_generation():
    try:
        kind = jax.devices()[0].device_kind.lower()
    except Exception:
        return "unknown"
    if "v7" in kind or "7x" in kind:
        return "v7x"
    if "v6" in kind:
        return "v6e"
    if "v5e" in kind or "v5 lite" in kind or "v5lite" in kind:
        return "v5e"
    return "unknown"


def make_ffn_config(d_model, d_ff, dtype=jnp.float32):
    gen = _tpu_generation()
    if gen == "v6e":
        # Need large tm to cover W1/W2 re-streaming per row tile (918 TF/s vs
        # ~1.4 TB/s); 128 MiB VMEM part -> allow ~100 MiB scoped.
        tm, tf, vmem_cap = 1024, 1024, 100 << 20
    elif gen == "v5e":
        # Compute-bound already at small tm; bigger tf cuts grid steps.
        tm, tf, vmem_cap = 256, 1024, 100 << 20
    else:
        # v7x (64 MiB VMEM, 2 TCs) and unknown parts: conservative budget.
        tm, tf, vmem_cap = 512, 512, 52 << 20
    d_model_p = _round_up(d_model, 128)
    tf = min(tf, _round_up(d_ff, 128))
    d_ff_p = _round_up(d_ff, tf)
    return FFNConfig(gen=gen, tm=tm, tf=tf, vmem_cap=vmem_cap,
                     d_model_p=d_model_p, d_ff_p=d_ff_p)


def prepare_ffn_params(w1, b1, w2, b2, cfg: FFNConfig):
    """Pad + re-layout weights once (NOT per forward call).

    w1: (d_model, d_ff), b1: (d_ff,), w2: (d_ff, d_model), b2: (d_model,).
    Returns (w1_slabs, b1p, w2p, b2p) with:
      w1_slabs: (n_k, d_model_p, tf)  -- each k-slab contiguous in HBM
      b1p:      (1, d_ff_p)
      w2p:      (d_ff_p, d_model_p)   -- k-slabs already contiguous
      b2p:      (1, d_model_p)
    """
    d_model, d_ff = w1.shape
    d_model_p, d_ff_p, tf = cfg.d_model_p, cfg.d_ff_p, cfg.tf
    n_k = d_ff_p // tf

    w1p = jnp.pad(w1, ((0, d_model_p - d_model), (0, d_ff_p - d_ff)))
    w1_slabs = w1p.reshape(d_model_p, n_k, tf).transpose(1, 0, 2)
    b1p = jnp.pad(b1.reshape(1, d_ff), ((0, 0), (0, d_ff_p - d_ff)))
    w2p = jnp.pad(w2, ((0, d_ff_p - d_ff), (0, d_model_p - d_model)))
    b2p = jnp.pad(b2.reshape(1, d_model), ((0, 0), (0, d_model_p - d_model)))
    return w1_slabs, b1p, w2p, b2p


# ----------------------------------------------------------------------------
# Forward
# ----------------------------------------------------------------------------
@functools.partial(jax.jit, static_argnames=("cfg",))
def ffn_forward(x, w1_slabs, b1p, w2p, b2p, *, cfg: FFNConfig):
    """x: (..., d_model); weights already prepared with prepare_ffn_params."""
    orig_shape = x.shape
    d_model = orig_shape[-1]
    M = 1
    for s in orig_shape[:-1]:
        M *= s

    d_model_p, d_ff_p, tf = cfg.d_model_p, cfg.d_ff_p, cfg.tf
    n_k = d_ff_p // tf

    itm = jnp.dtype(x.dtype).itemsize
    sublane = {4: 8, 2: 16, 1: 32}.get(itm, 8)

    # Row tiling: cap tm, spread M evenly across row tiles (minimal padding),
    # and keep both v7x TensorCores busy when M is large enough.
    tm = min(cfg.tm, _round_up(M, sublane))
    n_rows = _cdiv(M, tm)
    if cfg.gen == "v7x" and n_rows == 1 and M >= 2 * sublane:
        n_rows = 2
    tm = _round_up(_cdiv(M, n_rows), sublane)
    M_p = n_rows * tm

    x2 = x.reshape(M, d_model)
    if (M_p, d_model_p) != (M, d_model):
        x2 = jnp.pad(x2, ((0, M_p - M), (0, d_model_p - d_model)))

    # Double-buffered tile footprint + f32 accumulator + internal h scratch.
    est = (2 * itm * (tm * d_model_p          # x tile
                      + d_model_p * tf        # W1 slab
                      + tf * d_model_p        # W2 slab
                      + tf + d_model_p        # b1 slab + b2
                      + tm * d_model_p)       # output tile
           + 4 * tm * d_model_p               # f32 accumulator
           + (4 + itm) * tm * tf)             # f32 h + its cast buffer
    vmem_limit = int(min(cfg.vmem_cap, max(32 << 20, int(1.25 * est))))

    d_ff = w2p.shape[0] if d_ff_p == w2p.shape[0] else d_ff_p  # padded size
    cost = pl.CostEstimate(
        flops=4 * M * d_model * d_ff,
        transcendentals=0,
        bytes_accessed=itm * (2 * M * d_model + 2 * d_model_p * d_ff_p
                              + d_ff_p + d_model_p),
    )

    out2 = pl.pallas_call(
        _ffn_kernel,
        out_shape=jax.ShapeDtypeStruct((M_p, d_model_p), x.dtype),
        grid_spec=pltpu.PrefetchScalarGridSpec(
            num_scalar_prefetch=0,
            grid=(n_rows, n_k),
            in_specs=[
                pl.BlockSpec((tm, d_model_p), lambda i, k: (i, 0)),      # x
                pl.BlockSpec((1, d_model_p, tf), lambda i, k: (k, 0, 0)),  # W1 slab
                pl.BlockSpec((1, tf), lambda i, k: (0, k)),              # b1 slab
                pl.BlockSpec((tf, d_model_p), lambda i, k: (k, 0)),      # W2 slab
                pl.BlockSpec((1, d_model_p), lambda i, k: (0, 0)),       # b2
            ],
            out_specs=pl.BlockSpec((tm, d_model_p), lambda i, k: (i, 0)),
            scratch_shapes=[pltpu.VMEM((tm, d_model_p), jnp.float32)],
        ),
        compiler_params=pltpu.CompilerParams(
            dimension_semantics=("parallel", "arbitrary"),
            vmem_limit_bytes=vmem_limit,
        ),
        cost_estimate=cost,
    )(x2, w1_slabs, b1p, w2p, b2p)

    return out2[:M, :d_model].reshape(orig_shape)


def feed_forward(x, w1, b1, w2, b2):
    """One-shot convenience wrapper (prepares weights, then runs the kernel).

    For repeated calls, call make_ffn_config + prepare_ffn_params once and
    reuse the prepared params with ffn_forward.
    """
    cfg = make_ffn_config(w1.shape[0], w1.shape[1], x.dtype)
    params = prepare_ffn_params(w1, b1, w2, b2, cfg)
    return ffn_forward(x, *params, cfg=cfg)


# ----------------------------------------------------------------------------
# Test
# ----------------------------------------------------------------------------
def _init_params(key, d_model, d_ff, dtype=jnp.float32):
    # PyTorch Linear default init: U(-1/sqrt(fan_in), +1/sqrt(fan_in)).
    k1, k2, k3, k4 = jax.random.split(key, 4)
    lim1 = 1.0 / (d_model ** 0.5)
    lim2 = 1.0 / (d_ff ** 0.5)
    # Stored already transposed: w1 is (d_model, d_ff), w2 is (d_ff, d_model).
    w1 = jax.random.uniform(k1, (d_model, d_ff), dtype, -lim1, lim1)
    b1 = jax.random.uniform(k2, (d_ff,), dtype, -lim1, lim1)
    w2 = jax.random.uniform(k3, (d_ff, d_model), dtype, -lim2, lim2)
    b2 = jax.random.uniform(k4, (d_model,), dtype, -lim2, lim2)
    return w1, b1, w2, b2


if __name__ == "__main__":
    key = jax.random.PRNGKey(0)
    kx, kp = jax.random.split(key)

    batch, seq, d_model, d_ff = 2, 8, 32, 64
    x = jax.random.normal(kx, (batch, seq, d_model), jnp.float32)
    w1, b1, w2, b2 = _init_params(kp, d_model, d_ff)

    # Reference (eval-mode dropout == identity).
    ref = jnp.maximum(x.reshape(-1, d_model) @ w1 + b1.reshape(1, -1), 0.0) \
          @ w2 + b2.reshape(1, -1)
    ref = ref.reshape(batch, seq, d_model)

    # --- f32 path: prepare weights once, run the jitted kernel. ---
    cfg = make_ffn_config(d_model, d_ff, jnp.float32)
    params = prepare_ffn_params(w1, b1, w2, b2, cfg)
    out = ffn_forward(x, *params, cfg=cfg)
    jax.block_until_ready(out)
    assert out.shape == ref.shape and out.dtype == ref.dtype
    assert jnp.allclose(out, ref, atol=1e-4, rtol=1e-4), "f32 mismatch vs reference"

    # --- bf16 path (bf16 MXU, f32 accumulation): loose tolerance. ---
    cfg_bf = make_ffn_config(d_model, d_ff, jnp.bfloat16)
    params_bf = prepare_ffn_params(w1.astype(jnp.bfloat16), b1.astype(jnp.bfloat16),
                                   w2.astype(jnp.bfloat16), b2.astype(jnp.bfloat16),
                                   cfg_bf)
    out_bf = ffn_forward(x.astype(jnp.bfloat16), *params_bf, cfg=cfg_bf)
    jax.block_until_ready(out_bf)
    assert out_bf.shape == ref.shape and out_bf.dtype == jnp.bfloat16
    assert jnp.allclose(out_bf.astype(jnp.float32), ref, atol=1e-1, rtol=1e-1), \
        "bf16 mismatch vs reference"

    print("KERNEL_OK")
</pallas_src>

<mosaic_0001>
module attributes {stable_mosaic.version = 11 : i64} {
  func.func @_ffn_kernel(%arg0: i32, %arg1: i32, %arg2: memref<16x128xf32, #tpu.memory_space<vmem>>, %arg3: memref<1x128x128xf32, #tpu.memory_space<vmem>>, %arg4: memref<1x128xf32, #tpu.memory_space<vmem>>, %arg5: memref<128x128xf32, #tpu.memory_space<vmem>>, %arg6: memref<1x128xf32, #tpu.memory_space<vmem>>, %arg7: memref<16x128xf32, #tpu.memory_space<vmem>>, %arg8: memref<16x128xf32, #tpu.memory_space<vmem>>) attributes {dimension_semantics = [#tpu.dimension_semantics<parallel>, #tpu.dimension_semantics<arbitrary>], iteration_bounds = array<i64: 1, 1>, scalar_prefetch = 0 : i64, scratch_operands = 1 : i64, tpu.core_type = #tpu.core_type<tc>, window_params = [{transform_indices = @transform_0, window_bounds = array<i64: 16, 128>}, {transform_indices = @transform_1, window_bounds = array<i64: 1, 128, 128>}, {transform_indices = @transform_2, window_bounds = array<i64: 1, 128>}, {transform_indices = @transform_3, window_bounds = array<i64: 128, 128>}, {pipeline_mode = #tpu.pipeline_mode<synchronous>, transform_indices = @transform_4, window_bounds = array<i64: 1, 128>}, {transform_indices = @transform_5, window_bounds = array<i64: 16, 128>}]} {
    %c0_i32 = arith.constant 0 : i32
    %0 = arith.cmpi eq, %arg1, %c0_i32 : i32
    %1 = arith.extui %0 : i1 to i32
    %c0_i32_0 = arith.constant 0 : i32
    %2 = arith.cmpi ne, %1, %c0_i32_0 : i32
    scf.if %2 {
      %c0_17 = arith.constant 0 : index
      %c0_18 = arith.constant 0 : index
      %20 = vector.load %arg6[%c0_17, %c0_18] : memref<1x128xf32, #tpu.memory_space<vmem>>, vector<1x128xf32>
      %21 = vector.shape_cast %20 : vector<1x128xf32> to vector<1x128xf32>
      %22 = vector.broadcast %21 : vector<1x128xf32> to vector<16x128xf32>
      %c0_19 = arith.constant 0 : index
      %c0_20 = arith.constant 0 : index
      %23 = vector.load %arg8[%c0_19, %c0_20] : memref<16x128xf32, #tpu.memory_space<vmem>>, vector<16x128xf32>
      tpu.vector_store %arg8[%c0_19, %c0_20], %22 {strides = array<i32>} : memref<16x128xf32, #tpu.memory_space<vmem>>, vector<16x128xf32>,
    } else {
    }
    %c0 = arith.constant 0 : index
    %c0_1 = arith.constant 0 : index
    %3 = vector.load %arg2[%c0, %c0_1] : memref<16x128xf32, #tpu.memory_space<vmem>>, vector<16x128xf32>
    %c0_2 = arith.constant 0 : index
    %c0_3 = arith.constant 0 : index
    %c0_4 = arith.constant 0 : index
    %4 = vector.load %arg3[%c0_2, %c0_3, %c0_4] : memref<1x128x128xf32, #tpu.memory_space<vmem>>, vector<1x128x128xf32>
    %5 = vector.shape_cast %4 : vector<1x128x128xf32> to vector<128x128xf32>
    %cst = arith.constant dense<0.000000e+00> : vector<16x128xf32>
    %6 = tpu.matmul %3, %5, %cst {dimension_numbers = #tpu.dot_dimension_numbers<[1], [0], [0], [1], [0, 0, 1, 1], [], []>} : vector<16x128xf32>, vector<128x128xf32>, vector<16x128xf32> -> vector<16x128xf32>
    %c0_5 = arith.constant 0 : index
    %c0_6 = arith.constant 0 : index
    %7 = vector.load %arg4[%c0_5, %c0_6] : memref<1x128xf32, #tpu.memory_space<vmem>>, vector<1x128xf32>
    %8 = vector.broadcast %7 : vector<1x128xf32> to vector<16x128xf32>
    %9 = arith.addf %6, %8 : vector<16x128xf32>
    %cst_7 = arith.constant 0.000000e+00 : f32
    %10 = vector.broadcast %cst_7 : f32 to vector<16x128xf32>
    %11 = arith.maximumf %9, %10 : vector<16x128xf32>
    %c0_8 = arith.constant 0 : index
    %c0_9 = arith.constant 0 : index
    %12 = vector.load %arg8[%c0_8, %c0_9] : memref<16x128xf32, #tpu.memory_space<vmem>>, vector<16x128xf32>
    %c0_10 = arith.constant 0 : index
    %c0_11 = arith.constant 0 : index
    %13 = vector.load %arg5[%c0_10, %c0_11] : memref<128x128xf32, #tpu.memory_space<vmem>>, vector<128x128xf32>
    %cst_12 = arith.constant dense<0.000000e+00> : vector<16x128xf32>
    %14 = tpu.matmul %11, %13, %cst_12 {dimension_numbers = #tpu.dot_dimension_numbers<[1], [0], [0], [1], [0, 0, 1, 1], [], []>} : vector<16x128xf32>, vector<128x128xf32>, vector<16x128xf32> -> vector<16x128xf32>
    %15 = arith.addf %12, %14 : vector<16x128xf32>
    %c0_13 = arith.constant 0 : index
    %c0_14 = arith.constant 0 : index
    %16 = vector.load %arg8[%c0_13, %c0_14] : memref<16x128xf32, #tpu.memory_space<vmem>>, vector<16x128xf32>
    tpu.vector_store %arg8[%c0_13, %c0_14], %15 {strides = array<i32>} : memref<16x128xf32, #tpu.memory_space<vmem>>, vector<16x128xf32>,
    %c0_i32_15 = arith.constant 0 : i32
    %17 = arith.cmpi eq, %arg1, %c0_i32_15 : i32
    %18 = arith.extui %17 : i1 to i32
    %c0_i32_16 = arith.constant 0 : i32
    %19 = arith.cmpi ne, %18, %c0_i32_16 : i32
    scf.if %19 {
      %c0_17 = arith.constant 0 : index
      %c0_18 = arith.constant 0 : index
      %20 = vector.load %arg8[%c0_17, %c0_18] : memref<16x128xf32, #tpu.memory_space<vmem>>, vector<16x128xf32>
      %c0_19 = arith.constant 0 : index
      %c0_20 = arith.constant 0 : index
      %21 = vector.load %arg7[%c0_19, %c0_20] : memref<16x128xf32, #tpu.memory_space<vmem>>, vector<16x128xf32>
      tpu.vector_store %arg7[%c0_19, %c0_20], %20 {strides = array<i32>} : memref<16x128xf32, #tpu.memory_space<vmem>>, vector<16x128xf32>,
    } else {
    }
    return
  }
  func.func @transform_0(%arg0: i32, %arg1: i32) -> (i32, i32) {
    %c0_i32 = arith.constant 0 : i32
    %c0_i32_0 = arith.constant 0 : i32
    return %arg0, %c0_i32 : i32, i32
  }
  func.func @transform_1(%arg0: i32, %arg1: i32) -> (i32, i32, i32) {
    %c0_i32 = arith.constant 0 : i32
    %c0_i32_0 = arith.constant 0 : i32
    %c0_i32_1 = arith.constant 0 : i32
    return %arg1, %c0_i32, %c0_i32_0 : i32, i32, i32
  }
  func.func @transform_2(%arg0: i32, %arg1: i32) -> (i32, i32) {
    %c0_i32 = arith.constant 0 : i32
    %c0_i32_0 = arith.constant 0 : i32
    return %c0_i32, %arg1 : i32, i32
  }
  func.func @transform_3(%arg0: i32, %arg1: i32) -> (i32, i32) {
    %c0_i32 = arith.constant 0 : i32
    %c0_i32_0 = arith.constant 0 : i32
    return %arg1, %c0_i32 : i32, i32
  }
  func.func @transform_4(%arg0: i32, %arg1: i32) -> (i32, i32) {
    %c0_i32 = arith.constant 0 : i32
    %c0_i32_0 = arith.constant 0 : i32
    %c0_i32_1 = arith.constant 0 : i32
    return %c0_i32, %c0_i32_0 : i32, i32
  }
  func.func @transform_5(%arg0: i32, %arg1: i32) -> (i32, i32) {
    %c0_i32 = arith.constant 0 : i32
    %c0_i32_0 = arith.constant 0 : i32
    return %arg0, %c0_i32 : i32, i32
  }
}

</mosaic_0001>

<bundles_post_ra>
// kernel: ffn_forward.1
= control target key start
LH: loop header
LB: loop body
LE: loop exit
PB: predicated region body
PF: predicated region fallthrough
CT: control target
= control target key end

     0   :  { %10 = vsyncpa [#allocation4], 0  ;;  %s315_s0 = inlined_call_operand.vmem [shape: f32[16,128], index: 0, kind: input, shape index: {}]   ;;  %s316_s1 = inlined_call_operand.hbm [shape: f32[1,128,128], index: 1, kind: input, shape index: {}]   ;;  %s317_s2 = inlined_call_operand.vmem [shape: f32[1,128], index: 2, kind: input, shape index: {}]   ;;  %s318_s3 = inlined_call_operand.hbm [shape: f32[128,128], index: 3, kind: input, shape index: {}]   ;;  %s319_s4 = inlined_call_operand.vmem [shape: f32[1,128], index: 4, kind: input, shape index: {}]   ;;  %s320_s5 = inlined_call_operand.vmem [shape: f32[16,128], index: 5, kind: output, shape index: {}]  }
   0x1   :  { %s18_s20 = sshll.u32 %s316_s1, 4  ;;  %s19_s20 = int_to_ptr.hbm [resolvable:$true] %s18_s20 }
   0x2   :  { %11 = vsyncpa [#allocation6], 0  ;;  %s257_s21 = smov [#allocation3]   ;;  %s33_s25 = sshll.u32 %s318_s3, 4  ;;  %s34_s25 = int_to_ptr.hbm [resolvable:$true] %s33_s25 }
   0x3   :  { %s20_s22 = sshll.u32 %s257_s21, 4  ;;  %s258_s26 = smov 128   ;;  %s21_s22 = int_to_ptr.vmem [resolvable:$true] %s20_s22 }
   0x4   :  { %s259_s27 = smov 8   ;;  %s260_s28 = smov [#allocation5]  }
   0x5   :  { %26 = dma.hbm_to_vmem [thread:$0]  %s19_s20, 2048, %s21_s22, [#allocation4], %s258_s26, %s258_s26, %s259_s27  }
   0x6   :  { %s35_s29 = sshll.u32 %s260_s28, 4  ;;  %s36_s29 = int_to_ptr.vmem [resolvable:$true] %s35_s29 }
   0x7   :  { %41 = dma.hbm_to_vmem [thread:$0]  %s34_s25, 2048, %s36_s29, [#allocation6], %s258_s26, %s258_s26, %s259_s27  }
   0x8   :  { %253 = dma.done.wait [#allocation4], 2048  }
   0x9   :  { %254 = vsyncadd [#allocation4], 4294965248 }
   0xa   :  { %255 = dma.done.wait [#allocation6], 2048  }
   0xb   :  { %256 = vsyncadd [#allocation6], 4294965248  ;;  %v79_v0 = vld [vmem:[#allocation3 + $0x78] sm:$0xff]  ;;  %v78_v1 = vld [vmem:[#allocation3 + $0x70] sm:$0xff] }
   0xc   :  { %167 = vmatpush.msra.mxu2 %v79_v0  ;;  %84 = vmatpush.msra.mxu0 %v79_v0  ;;  %v77_v2 = vld [vmem:[#allocation3 + $0x68] sm:$0xff]  ;;  %v76_v3 = vld [vmem:[#allocation3 + $0x60] sm:$0xff]  ;;  %v75_v4 = vld [vmem:[#allocation3 + $0x58] sm:$0xff] }
   0xd   :  { %v126_v5 = vld [vmem:[#allocation5 + $0x78] sm:$0xff]  ;;  %v125_v6 = vld [vmem:[#allocation5 + $0x70] sm:$0xff]  ;;  %v124_v8 = vld [vmem:[#allocation5 + $0x68] sm:$0xff] }
   0xe   :  { %168 = vmatpush.msra.mxu2 %v78_v1  ;;  %85 = vmatpush.msra.mxu0 %v78_v1  ;;  %v74_v7 = vld [vmem:[#allocation3 + $0x50] sm:$0xff]  ;;  %v73_v9 = vld [vmem:[#allocation3 + $0x48] sm:$0xff]  ;;  %v123_v10 = vld [vmem:[#allocation5 + $0x60] sm:$0xff] }
   0xf   :  { %183 = vmatpush.msra.mxu3 %v126_v5  ;;  %127 = vmatpush.msra.mxu1 %v126_v5  ;;  %v72_v11 = vld [vmem:[#allocation3 + $0x40] sm:$0xff]  ;;  %v122_v12 = vld [vmem:[#allocation5 + $0x58] sm:$0xff]  ;;  %v121_v14 = vld [vmem:[#allocation5 + $0x50] sm:$0xff] }
  0x10   :  { %169 = vmatpush.msra.mxu2 %v77_v2  ;;  %86 = vmatpush.msra.mxu0 %v77_v2  ;;  %v71_v13 = vld [vmem:[#allocation3 + $0x38] sm:$0xff]  ;;  %v70_v15 = vld [vmem:[#allocation3 + $0x30] sm:$0xff]  ;;  %v120_v16 = vld [vmem:[#allocation5 + $0x48] sm:$0xff] }
  0x11   :  { %184 = vmatpush.msra.mxu3 %v125_v6  ;;  %128 = vmatpush.msra.mxu1 %v125_v6  ;;  %v69_v17 = vld [vmem:[#allocation3 + $0x28] sm:$0xff]  ;;  %v119_v18 = vld [vmem:[#allocation5 + $0x40] sm:$0xff]  ;;  %v118_v20 = vld [vmem:[#allocation5 + $0x38] sm:$0xff] }
  0x12   :  { %170 = vmatpush.msra.mxu2 %v76_v3  ;;  %87 = vmatpush.msra.mxu0 %v76_v3  ;;  %v68_v19 = vld [vmem:[#allocation3 + $0x20] sm:$0xff]  ;;  %v67_v21 = vld [vmem:[#allocation3 + $0x18] sm:$0xff]  ;;  %v117_v22 = vld [vmem:[#allocation5 + $0x30] sm:$0xff] }
  0x13   :  { %185 = vmatpush.msra.mxu3 %v124_v8  ;;  %129 = vmatpush.msra.mxu1 %v124_v8  ;;  %v66_v23 = vld [vmem:[#allocation3 + $0x10] sm:$0xff]  ;;  %v116_v24 = vld [vmem:[#allocation5 + $0x28] sm:$0xff]  ;;  %v115_v26 = vld [vmem:[#allocation5 + $0x20] sm:$0xff] }
  0x14   :  { %171 = vmatpush.msra.mxu2 %v75_v4  ;;  %88 = vmatpush.msra.mxu0 %v75_v4  ;;  %v65_v25 = vld [vmem:[#allocation3 + $0x8] sm:$0xff]  ;;  %v64_v27 = vld [vmem:[#allocation3] sm:$0xff]  ;;  %v114_v30 = vld [vmem:[#allocation5 + $0x18] sm:$0xff] }
  0x15   :  { %186 = vmatpush.msra.mxu3 %v123_v10  ;;  %130 = vmatpush.msra.mxu1 %v123_v10  ;;  %v63_v28 = vld [vmem:[%s315_s0 + $0x8] sm:$0xff]  ;;  %v62_v29 = vld [vmem:[%s315_s0] sm:$0xff]  ;;  %v113_v31 = vld [vmem:[#allocation5 + $0x10] sm:$0xff] }
  0x16   :  { %172 = vmatpush.msra.mxu2 %v74_v7  ;;  %89 = vmatpush.msra.mxu0 %v74_v7  ;;  %v112_v32 = vld [vmem:[#allocation5 + $0x8] sm:$0xff]  ;;  %v111_v33 = vld [vmem:[#allocation5] sm:$0xff] }
  0x17   :  { %187 = vmatpush.msra.mxu3 %v122_v12  ;;  %131 = vmatpush.msra.mxu1 %v122_v12  ;;  %v203_v34 = vld [vmem:[%s317_s2] ss:$0 sm:$0xff] }
  0x18   :  { %173 = vmatpush.msra.mxu2 %v73_v9  ;;  %90 = vmatpush.msra.mxu0 %v73_v9  ;;  %v204_v41 = vld [vmem:[%s319_s4] ss:$0 sm:$0xff] }
  0x19   :  { %188 = vmatpush.msra.mxu3 %v121_v14  ;;  %132 = vmatpush.msra.mxu1 %v121_v14 }
  0x1a   :  { %174 = vmatpush.msra.mxu2 %v72_v11  ;;  %91 = vmatpush.msra.mxu0 %v72_v11 }
  0x1b   :  { %189 = vmatpush.msra.mxu3 %v120_v16  ;;  %133 = vmatpush.msra.mxu1 %v120_v16 }
  0x1c   :  { %175 = vmatpush.msra.mxu2 %v71_v13  ;;  %92 = vmatpush.msra.mxu0 %v71_v13 }
  0x1d   :  { %190 = vmatpush.msra.mxu3 %v119_v18  ;;  %134 = vmatpush.msra.mxu1 %v119_v18 }
  0x1e   :  { %176 = vmatpush.msra.mxu2 %v70_v15  ;;  %93 = vmatpush.msra.mxu0 %v70_v15 }
  0x1f   :  { %191 = vmatpush.msra.mxu3 %v118_v20  ;;  %135 = vmatpush.msra.mxu1 %v118_v20 }
  0x20   :  { %177 = vmatpush.msra.mxu2 %v69_v17  ;;  %94 = vmatpush.msra.mxu0 %v69_v17 }
  0x21   :  { %192 = vmatpush.msra.mxu3 %v117_v22  ;;  %136 = vmatpush.msra.mxu1 %v117_v22 }
  0x22   :  { %178 = vmatpush.msra.mxu2 %v68_v19  ;;  %95 = vmatpush.msra.mxu0 %v68_v19 }
  0x23   :  { %193 = vmatpush.msra.mxu3 %v116_v24  ;;  %137 = vmatpush.msra.mxu1 %v116_v24 }
  0x24   :  { %179 = vmatpush.msra.mxu2 %v67_v21  ;;  %96 = vmatpush.msra.mxu0 %v67_v21 }
  0x25   :  { %194 = vmatpush.msra.mxu3 %v115_v26  ;;  %138 = vmatpush.msra.mxu1 %v115_v26 }
  0x26   :  { %180 = vmatpush.msra.mxu2 %v66_v23  ;;  %97 = vmatpush.msra.mxu0 %v66_v23 }
  0x27   :  { %195 = vmatpush.msra.mxu3 %v114_v30  ;;  %139 = vmatpush.msra.mxu1 %v114_v30 }
  0x28   :  { %181 = vmatpush.msra.mxu2 %v65_v25  ;;  %98 = vmatpush.msra.mxu0 %v65_v25 }
  0x29   :  { %196 = vmatpush.msra.mxu3 %v113_v31  ;;  %140 = vmatpush.msra.mxu1 %v113_v31 }
  0x2a   :  { %182 = vmatpush.msra.mxu2 %v64_v27  ;;  %99 = vmatpush.msra.mxu0 %v64_v27 }
  0x2b   :  { %103 = vmatmul.f32.vlgmr.msra.gmra.mxu2 %v63_v28  ;;  %100 = vmatmul.f32.vlgmr.msra.gmra.mxu0 %v62_v29 }
  0x2c   :  { %197 = vmatpush.msra.mxu3 %v112_v32  ;;  %141 = vmatpush.msra.mxu1 %v112_v32 }
  0x2e   :  { %198 = vmatpush.msra.mxu3 %v111_v33  ;;  %142 = vmatpush.msra.mxu1 %v111_v33 }
  0xa8   :  { %v101_v35 = vpop.f32.mrf.mxu0 }
  0xa9   :  { %v102_v36 = vadd.f32 %v203_v34, %v101_v35 }
  0xab   :  { %v107_v37 = vmax.f32 %v102_v36, 0.0 }
  0xad   :  { %143 = vmatmul.f32.vlgmr.msra.gmra.mxu1 %v107_v37 }
  0xae   :  { %v104_v38 = vpop.f32.mrf.mxu2 }
  0xaf   :  { %v105_v39 = vadd.f32 %v203_v34, %v104_v38 }
  0xb1   :  { %v108_v40 = vmax.f32 %v105_v39, 0.0 }
  0xb3   :  { %146 = vmatmul.f32.vlgmr.msra.gmra.mxu3 %v108_v40 }
 0x12a   :  { %v144_v42 = vpop.f32.mrf.mxu1 }
 0x12b   :  { %v150_v43 = vadd.f32 %v204_v41, %v144_v42 }
 0x12d   :  { %159 = vst [vmem:[%s320_s5] sm:$0xff] %v150_v43 }
 0x136   :  { %v147_v44 = vpop.f32.mrf.mxu3 }
 0x137   :  { %v151_v45 = vadd.f32 %v204_v41, %v147_v44 }
 0x139   :  { %160 = vst [vmem:[%s320_s5 + $0x8] sm:$0xff] %v151_v45 }
 0x13a   :  { %165 = vsyncpa [#allocation4], 1 }
 0x13b   :  { %166 = vsyncpa [#allocation6], 1 }

</bundles_post_ra>
